<compile_context>
chip_gen: v7x
topology: tpu7x:2x2x1
jax: 0.10.0
libtpu: 0.0.40
codegen_flags: <defaults>
</compile_context>

<pallas_src>
import jax
import jax.numpy as jnp
from jax.experimental import pallas as pl
from jax.experimental.pallas import tpu as pltpu

STATE = 32      # np.prod(state_shape)
ACTION = 4      # np.prod(action_shape)
HIDDEN = 128
OUT_PAD = 128   # final weight padded to a full 128-lane MXU face


def mlp_kernel(x_ref,
               w1_ref, b1_ref,
               w2_ref, b2_ref,
               w3_ref, b3_ref,
               w4_ref, b4_ref,
               o_ref):
    # Whole MLP fused; all operands live in VMEM for this batch tile.
    cdt = w1_ref.dtype  # compute dtype of the matmul operands (f32 or bf16)
    h = jnp.dot(x_ref[...], w1_ref[...], preferred_element_type=jnp.float32)
    h = jnp.maximum(h + b1_ref[...], 0.0).astype(cdt)
    h = jnp.dot(h, w2_ref[...], preferred_element_type=jnp.float32)
    h = jnp.maximum(h + b2_ref[...], 0.0).astype(cdt)
    h = jnp.dot(h, w3_ref[...], preferred_element_type=jnp.float32)
    h = jnp.maximum(h + b3_ref[...], 0.0).astype(cdt)
    logits = jnp.dot(h, w4_ref[...], preferred_element_type=jnp.float32) + b4_ref[...]
    # Store only the ACTION real lanes: narrow but contiguous HBM write.
    o_ref[...] = logits[:, :ACTION].astype(o_ref.dtype)


def _cdiv(a, b):
    return -(-a // b)


def _round_up(x, m):
    return (x + m - 1) // m * m


def _choose_tiling(batch, tm):
    """Pick (tile_m, n_tiles): tile_m multiple of 8, minimal padding, and at least
    2 (even) tiles when the batch is big enough so v7x megacore can split them."""
    n_tiles = _cdiv(batch, tm)
    if batch >= 16:
        n_tiles = max(n_tiles, 2)
    if n_tiles > 1 and n_tiles % 2 == 1:
        n_tiles += 1
    tile_m = _round_up(_cdiv(batch, n_tiles), 8)
    n_tiles = _cdiv(batch, tile_m)
    return tile_m, n_tiles


def net_forward(obs, params, *, tm=1024, compute_dtype=jnp.float32):
    """Pallas equivalent of Net.forward: returns (logits, state=None)."""
    batch = obs.shape[0]
    obs2d = obs.reshape(batch, -1)                       # obs.view(batch, -1)
    if obs2d.dtype != compute_dtype:
        obs2d = obs2d.astype(compute_dtype)

    (w1, b1), (w2, b2), (w3, b3), (w4, b4) = params

    # Pad the 4-wide final weight/bias to 128 lanes (zero columns).
    w4p = jnp.zeros((HIDDEN, OUT_PAD), w4.dtype).at[:, :ACTION].set(w4)
    b4p = jnp.zeros((1, OUT_PAD), jnp.float32).at[:, :ACTION].set(b4)

    if compute_dtype != jnp.float32:
        # bf16 operand path (v6e/v7x MXU); biases and accumulation stay f32.
        w1, w2, w3, w4p = (w.astype(compute_dtype) for w in (w1, w2, w3, w4p))

    tile_m, n_tiles = _choose_tiling(batch, tm)
    grid = (n_tiles,)

    def resident(shape):
        # Full-array block, constant block index -> fetched once, stays in VMEM.
        return pl.BlockSpec(shape, lambda i: (0, 0))

    param_bytes = sum(int(a.size) * a.dtype.itemsize
                      for a in (w1, b1, w2, b2, w3, b3, w4p, b4p))
    cost = pl.CostEstimate(
        flops=2 * batch * (STATE * HIDDEN + 2 * HIDDEN * HIDDEN + HIDDEN * OUT_PAD),
        transcendentals=0,
        bytes_accessed=batch * (STATE * obs2d.dtype.itemsize + ACTION * 4) + param_bytes,
    )

    logits = pl.pallas_call(
        mlp_kernel,
        out_shape=jax.ShapeDtypeStruct((batch, ACTION), jnp.float32),
        grid=grid,
        in_specs=[
            pl.BlockSpec((tile_m, STATE), lambda i: (i, 0)),   # x advances with i
            resident((STATE, HIDDEN)), resident((1, HIDDEN)),
            resident((HIDDEN, HIDDEN)), resident((1, HIDDEN)),
            resident((HIDDEN, HIDDEN)), resident((1, HIDDEN)),
            resident((HIDDEN, OUT_PAD)), resident((1, OUT_PAD)),
        ],
        out_specs=pl.BlockSpec((tile_m, ACTION), lambda i: (i, 0)),
        compiler_params=pltpu.CompilerParams(
            dimension_semantics=("parallel",)),   # batch tiles split across TCs (v7x)
        cost_estimate=cost,
    )(obs2d, w1, b1, w2, b2, w3, b3, w4p, b4p)

    return logits, None


def init_params(key):
    """Deterministic init mirroring torch.nn.Linear default
    (U[-1/sqrt(fan_in), +1/sqrt(fan_in)]). Weights stored transposed as (in, out)."""
    dims = [(STATE, HIDDEN), (HIDDEN, HIDDEN), (HIDDEN, HIDDEN), (HIDDEN, ACTION)]
    params = []
    for (fan_in, fan_out) in dims:
        key, kw, kb = jax.random.split(key, 3)
        bound = 1.0 / jnp.sqrt(jnp.float32(fan_in))
        w = jax.random.uniform(kw, (fan_in, fan_out), jnp.float32, -bound, bound)
        b = jax.random.uniform(kb, (1, fan_out), jnp.float32, -bound, bound)
        params.append((w, b))
    return params


def ref_forward(x, params):
    h = x
    for i, (w, b) in enumerate(params):
        h = h @ w + b
        if i < len(params) - 1:
            h = jnp.maximum(h, 0.0)
    return h


if __name__ == "__main__":
    key = jax.random.PRNGKey(0)
    params = init_params(key)

    ok = True

    # Small batch (single tile, grid=1) — matches the original test case.
    key, kx = jax.random.split(key)
    obs_small = jax.random.normal(kx, (8, STATE), jnp.float32)
    logits_s, state_s = net_forward(obs_small, params)
    jax.block_until_ready(logits_s)
    exp_s = ref_forward(obs_small, params)
    ok &= logits_s.shape == (8, ACTION)
    ok &= state_s is None
    ok &= bool(jnp.allclose(logits_s, exp_s, atol=1e-5, rtol=1e-5))

    # Larger, non-multiple batch: ragged last tile + 2-tile grid (v7x megacore path).
    key, kx = jax.random.split(key)
    obs_big = jax.random.normal(kx, (500, STATE), jnp.float32)
    logits_b, state_b = net_forward(obs_big, params)
    jax.block_until_ready(logits_b)
    exp_b = ref_forward(obs_big, params)
    ok &= logits_b.shape == (500, ACTION)
    ok &= state_b is None
    ok &= bool(jnp.allclose(logits_b, exp_b, atol=1e-5, rtol=1e-5))

    # Optional bf16 operand path (v6e/v7x MXU) — relaxed tolerance vs f32 reference.
    logits_bf, _ = net_forward(obs_big, params, compute_dtype=jnp.bfloat16)
    jax.block_until_ready(logits_bf)
    ok &= bool(jnp.allclose(logits_bf, exp_b, atol=5e-2, rtol=0.0))

    assert ok
    print("KERNEL_OK")
</pallas_src>

<mosaic_0001>
module attributes {stable_mosaic.version = 11 : i64} {
  func.func @mlp_kernel(%arg0: i32, %arg1: memref<8x32xf32, #tpu.memory_space<vmem>>, %arg2: memref<32x128xf32, #tpu.memory_space<vmem>>, %arg3: memref<1x128xf32, #tpu.memory_space<vmem>>, %arg4: memref<128x128xf32, #tpu.memory_space<vmem>>, %arg5: memref<1x128xf32, #tpu.memory_space<vmem>>, %arg6: memref<128x128xf32, #tpu.memory_space<vmem>>, %arg7: memref<1x128xf32, #tpu.memory_space<vmem>>, %arg8: memref<128x128xf32, #tpu.memory_space<vmem>>, %arg9: memref<1x128xf32, #tpu.memory_space<vmem>>, %arg10: memref<8x4xf32, #tpu.memory_space<vmem>>) attributes {dimension_semantics = [#tpu.dimension_semantics<parallel>], iteration_bounds = array<i64: 1>, scalar_prefetch = 0 : i64, scratch_operands = 0 : i64, tpu.core_type = #tpu.core_type<tc>, window_params = [{transform_indices = @transform_0, window_bounds = array<i64: 8, 32>}, {pipeline_mode = #tpu.pipeline_mode<synchronous>, transform_indices = @transform_1, window_bounds = array<i64: 32, 128>}, {pipeline_mode = #tpu.pipeline_mode<synchronous>, transform_indices = @transform_2, window_bounds = array<i64: 1, 128>}, {pipeline_mode = #tpu.pipeline_mode<synchronous>, transform_indices = @transform_3, window_bounds = array<i64: 128, 128>}, {pipeline_mode = #tpu.pipeline_mode<synchronous>, transform_indices = @transform_4, window_bounds = array<i64: 1, 128>}, {pipeline_mode = #tpu.pipeline_mode<synchronous>, transform_indices = @transform_5, window_bounds = array<i64: 128, 128>}, {pipeline_mode = #tpu.pipeline_mode<synchronous>, transform_indices = @transform_6, window_bounds = array<i64: 1, 128>}, {pipeline_mode = #tpu.pipeline_mode<synchronous>, transform_indices = @transform_7, window_bounds = array<i64: 128, 128>}, {pipeline_mode = #tpu.pipeline_mode<synchronous>, transform_indices = @transform_8, window_bounds = array<i64: 1, 128>}, {transform_indices = @transform_9, window_bounds = array<i64: 8, 4>}]} {
    %c0 = arith.constant 0 : index
    %c0_0 = arith.constant 0 : index
    %0 = vector.load %arg1[%c0, %c0_0] : memref<8x32xf32, #tpu.memory_space<vmem>>, vector<8x32xf32>
    %c0_1 = arith.constant 0 : index
    %c0_2 = arith.constant 0 : index
    %1 = vector.load %arg2[%c0_1, %c0_2] : memref<32x128xf32, #tpu.memory_space<vmem>>, vector<32x128xf32>
    %cst = arith.constant dense<0.000000e+00> : vector<8x128xf32>
    %2 = tpu.matmul %0, %1, %cst {dimension_numbers = #tpu.dot_dimension_numbers<[1], [0], [0], [1], [0, 0, 1, 1], [], []>} : vector<8x32xf32>, vector<32x128xf32>, vector<8x128xf32> -> vector<8x128xf32>
    %c0_3 = arith.constant 0 : index
    %c0_4 = arith.constant 0 : index
    %3 = vector.load %arg3[%c0_3, %c0_4] : memref<1x128xf32, #tpu.memory_space<vmem>>, vector<1x128xf32>
    %4 = vector.broadcast %3 : vector<1x128xf32> to vector<8x128xf32>
    %5 = arith.addf %2, %4 : vector<8x128xf32>
    %cst_5 = arith.constant 0.000000e+00 : f32
    %6 = vector.broadcast %cst_5 : f32 to vector<8x128xf32>
    %7 = arith.maximumf %5, %6 : vector<8x128xf32>
    %c0_6 = arith.constant 0 : index
    %c0_7 = arith.constant 0 : index
    %8 = vector.load %arg4[%c0_6, %c0_7] : memref<128x128xf32, #tpu.memory_space<vmem>>, vector<128x128xf32>
    %cst_8 = arith.constant dense<0.000000e+00> : vector<8x128xf32>
    %9 = tpu.matmul %7, %8, %cst_8 {dimension_numbers = #tpu.dot_dimension_numbers<[1], [0], [0], [1], [0, 0, 1, 1], [], []>} : vector<8x128xf32>, vector<128x128xf32>, vector<8x128xf32> -> vector<8x128xf32>
    %c0_9 = arith.constant 0 : index
    %c0_10 = arith.constant 0 : index
    %10 = vector.load %arg5[%c0_9, %c0_10] : memref<1x128xf32, #tpu.memory_space<vmem>>, vector<1x128xf32>
    %11 = vector.broadcast %10 : vector<1x128xf32> to vector<8x128xf32>
    %12 = arith.addf %9, %11 : vector<8x128xf32>
    %cst_11 = arith.constant 0.000000e+00 : f32
    %13 = vector.broadcast %cst_11 : f32 to vector<8x128xf32>
    %14 = arith.maximumf %12, %13 : vector<8x128xf32>
    %c0_12 = arith.constant 0 : index
    %c0_13 = arith.constant 0 : index
    %15 = vector.load %arg6[%c0_12, %c0_13] : memref<128x128xf32, #tpu.memory_space<vmem>>, vector<128x128xf32>
    %cst_14 = arith.constant dense<0.000000e+00> : vector<8x128xf32>
    %16 = tpu.matmul %14, %15, %cst_14 {dimension_numbers = #tpu.dot_dimension_numbers<[1], [0], [0], [1], [0, 0, 1, 1], [], []>} : vector<8x128xf32>, vector<128x128xf32>, vector<8x128xf32> -> vector<8x128xf32>
    %c0_15 = arith.constant 0 : index
    %c0_16 = arith.constant 0 : index
    %17 = vector.load %arg7[%c0_15, %c0_16] : memref<1x128xf32, #tpu.memory_space<vmem>>, vector<1x128xf32>
    %18 = vector.broadcast %17 : vector<1x128xf32> to vector<8x128xf32>
    %19 = arith.addf %16, %18 : vector<8x128xf32>
    %cst_17 = arith.constant 0.000000e+00 : f32
    %20 = vector.broadcast %cst_17 : f32 to vector<8x128xf32>
    %21 = arith.maximumf %19, %20 : vector<8x128xf32>
    %c0_18 = arith.constant 0 : index
    %c0_19 = arith.constant 0 : index
    %22 = vector.load %arg8[%c0_18, %c0_19] : memref<128x128xf32, #tpu.memory_space<vmem>>, vector<128x128xf32>
    %cst_20 = arith.constant dense<0.000000e+00> : vector<8x128xf32>
    %23 = tpu.matmul %21, %22, %cst_20 {dimension_numbers = #tpu.dot_dimension_numbers<[1], [0], [0], [1], [0, 0, 1, 1], [], []>} : vector<8x128xf32>, vector<128x128xf32>, vector<8x128xf32> -> vector<8x128xf32>
    %c0_21 = arith.constant 0 : index
    %c0_22 = arith.constant 0 : index
    %24 = vector.load %arg9[%c0_21, %c0_22] : memref<1x128xf32, #tpu.memory_space<vmem>>, vector<1x128xf32>
    %25 = vector.broadcast %24 : vector<1x128xf32> to vector<8x128xf32>
    %26 = arith.addf %23, %25 : vector<8x128xf32>
    %27 = vector.extract_strided_slice %26 {offsets = [0, 0], sizes = [8, 4], strides = [1, 1]} : vector<8x128xf32> to vector<8x4xf32>
    %c0_23 = arith.constant 0 : index
    %c0_24 = arith.constant 0 : index
    %28 = vector.load %arg10[%c0_23, %c0_24] : memref<8x4xf32, #tpu.memory_space<vmem>>, vector<8x4xf32>
    tpu.vector_store %arg10[%c0_23, %c0_24], %27 {strides = array<i32>} : memref<8x4xf32, #tpu.memory_space<vmem>>, vector<8x4xf32>,
    return
  }
  func.func @transform_0(%arg0: i32) -> (i32, i32) {
    %c0_i32 = arith.constant 0 : i32
    %c0_i32_0 = arith.constant 0 : i32
    return %arg0, %c0_i32 : i32, i32
  }
  func.func @transform_1(%arg0: i32) -> (i32, i32) {
    %c0_i32 = arith.constant 0 : i32
    %c0_i32_0 = arith.constant 0 : i32
    %c0_i32_1 = arith.constant 0 : i32
    return %c0_i32, %c0_i32_0 : i32, i32
  }
  func.func @transform_2(%arg0: i32) -> (i32, i32) {
    %c0_i32 = arith.constant 0 : i32
    %c0_i32_0 = arith.constant 0 : i32
    %c0_i32_1 = arith.constant 0 : i32
    return %c0_i32, %c0_i32_0 : i32, i32
  }
  func.func @transform_3(%arg0: i32) -> (i32, i32) {
    %c0_i32 = arith.constant 0 : i32
    %c0_i32_0 = arith.constant 0 : i32
    %c0_i32_1 = arith.constant 0 : i32
    return %c0_i32, %c0_i32_0 : i32, i32
  }
  func.func @transform_4(%arg0: i32) -> (i32, i32) {
    %c0_i32 = arith.constant 0 : i32
    %c0_i32_0 = arith.constant 0 : i32
    %c0_i32_1 = arith.constant 0 : i32
    return %c0_i32, %c0_i32_0 : i32, i32
  }
  func.func @transform_5(%arg0: i32) -> (i32, i32) {
    %c0_i32 = arith.constant 0 : i32
    %c0_i32_0 = arith.constant 0 : i32
    %c0_i32_1 = arith.constant 0 : i32
    return %c0_i32, %c0_i32_0 : i32, i32
  }
  func.func @transform_6(%arg0: i32) -> (i32, i32) {
    %c0_i32 = arith.constant 0 : i32
    %c0_i32_0 = arith.constant 0 : i32
    %c0_i32_1 = arith.constant 0 : i32
    return %c0_i32, %c0_i32_0 : i32, i32
  }
  func.func @transform_7(%arg0: i32) -> (i32, i32) {
    %c0_i32 = arith.constant 0 : i32
    %c0_i32_0 = arith.constant 0 : i32
    %c0_i32_1 = arith.constant 0 : i32
    return %c0_i32, %c0_i32_0 : i32, i32
  }
  func.func @transform_8(%arg0: i32) -> (i32, i32) {
    %c0_i32 = arith.constant 0 : i32
    %c0_i32_0 = arith.constant 0 : i32
    %c0_i32_1 = arith.constant 0 : i32
    return %c0_i32, %c0_i32_0 : i32, i32
  }
  func.func @transform_9(%arg0: i32) -> (i32, i32) {
    %c0_i32 = arith.constant 0 : i32
    %c0_i32_0 = arith.constant 0 : i32
    return %arg0, %c0_i32 : i32, i32
  }
}

</mosaic_0001>

<bundles_post_ra>
// kernel: tpu_custom_call.1
= control target key start
LH: loop header
LB: loop body
LE: loop exit
PB: predicated region body
PF: predicated region fallthrough
CT: control target
= control target key end

     0   :  { %14 = vsyncpa [#allocation3], 0  ;;  %s1037_s0 = inlined_call_operand.hbm [shape: f32[8,32], index: 0, kind: input, shape index: {}]   ;;  %s1038_s1 = inlined_call_operand.hbm [shape: f32[32,128], index: 1, kind: input, shape index: {}]   ;;  %s1039_s2 = inlined_call_operand.vmem [shape: f32[1,128], index: 2, kind: input, shape index: {}]   ;;  %s1040_s3 = inlined_call_operand.hbm [shape: f32[128,128], index: 3, kind: input, shape index: {}]   ;;  %s1041_s4 = inlined_call_operand.vmem [shape: f32[1,128], index: 4, kind: input, shape index: {}]   ;;  %s1042_s5 = inlined_call_operand.hbm [shape: f32[128,128], index: 5, kind: input, shape index: {}]   ;;  %s1043_s6 = inlined_call_operand.vmem [shape: f32[1,128], index: 6, kind: input, shape index: {}]   ;;  %s1044_s7 = inlined_call_operand.hbm [shape: f32[128,128], index: 7, kind: input, shape index: {}]   ;;  %s1045_s8 = inlined_call_operand.vmem [shape: f32[1,128], index: 8, kind: input, shape index: {}]   ;;  %s1046_s9 = inlined_call_operand.vmem [shape: f32[8,4], index: 9, kind: output, shape index: {}]  }
   0x1   :  { %15 = vsyncpa [#allocation5], 0 }
   0x2   :  { %16 = vsyncpa [#allocation8], 0  ;;  %s856_s30 = smov [#allocation4]   ;;  %s740_s13 = scalar_lea.hbm %s1038_s1, 512 }
   0x3   :  { %s32_s10 = sshll.u32 %s856_s30, 4  ;;  %p741_p0 = scmp.ne.s32.totalorder %s1038_s1, %s740_s13  ;;  %s33_s10 = int_to_ptr.vmem [resolvable:$true] %s32_s10 }
   0x4   :  { %p744_p1 = scmp.lt.u32.totalorder %s740_s13, %s1038_s1 }
   0x6   :  { %p746_p2 = pnand %p744_p1, %p741_p0 }
   0x8   :  { %749 = shalt.err (!%p746_p2)
}
   0x9   :  { %s750_s18 = scalar_lea.vmem %s33_s10, 512  ;;  %p755_p4 = scmp.lt.s32.totalorder %s33_s10, %s33_s10 }
   0xa   :  { %p751_p3 = scmp.ne.s32.totalorder %s33_s10, %s750_s18  ;;  %p756_p5 = scmp.lt.s32.totalorder %s750_s18, %s750_s18 }
   0xc   :  { %p757_p6 = por %p756_p5, %p755_p4 }
   0xe   :  { %p758_p7 = pnand %p757_p6, %p751_p3 }
  0x10   :  { %761 = shalt.err (!%p758_p7)
}
  0x11   :  { %s857_s19 = smov 128   ;;  %s858_s20 = smov 8  }
  0x12   :  { %38 = dma.hbm_to_vmem [thread:$0]  %s1038_s1, 512, %s33_s10, [#allocation5], %s857_s19, %s857_s19, %s858_s20  }
  0x13   :  { %s859_s23 = smov [#allocation7]   ;;  %s860_s25 = smov [#allocation2]  }
  0x14   :  { %s60_s24 = sshll.u32 %s859_s23, 4  ;;  %s23_s26 = sshll.u32 %s860_s25, 4  ;;  %s61_s24 = int_to_ptr.vmem [resolvable:$true] %s60_s24  ;;  %s24_s26 = int_to_ptr.vmem [resolvable:$true] %s23_s26 }
  0x15   :  { %s762_s29 = scalar_lea.hbm %s1042_s5, 2048 }
  0x16   :  { %p763_p8 = scmp.ne.s32.totalorder %s1042_s5, %s762_s29  ;;  %p766_p9 = scmp.lt.u32.totalorder %s762_s29, %s1042_s5 }
  0x18   :  { %p768_p10 = pnand %p766_p9, %p763_p8 }
  0x1a   :  { %771 = shalt.err (!%p768_p10)
}
  0x1b   :  { %s772_s1 = scalar_lea.vmem %s61_s24, 2048  ;;  %p777_p12 = scmp.lt.s32.totalorder %s61_s24, %s61_s24 }
  0x1c   :  { %p773_p11 = scmp.ne.s32.totalorder %s61_s24, %s772_s1  ;;  %p778_p13 = scmp.lt.s32.totalorder %s772_s1, %s772_s1 }
  0x1e   :  { %p779_p0 = por %p778_p13, %p777_p12 }
  0x20   :  { %p780_p1 = pnand %p779_p0, %p773_p11 }
  0x22   :  { %783 = shalt.err (!%p780_p1)
}
  0x23   :  { %66 = dma.hbm_to_vmem [thread:$0]  %s1042_s5, 2048, %s61_s24, [#allocation8], %s857_s19, %s857_s19, %s858_s20  }
  0x24   :  { %s784_s17 = scalar_lea.hbm %s1037_s0, 128 }
  0x25   :  { %p785_p2 = scmp.ne.s32.totalorder %s1037_s0, %s784_s17  ;;  %p788_p3 = scmp.lt.u32.totalorder %s784_s17, %s1037_s0 }
  0x27   :  { %p790_p4 = pnand %p788_p3, %p785_p2 }
  0x29   :  { %793 = shalt.err (!%p790_p4)
}
  0x2a   :  { %s794_s25 = scalar_lea.vmem %s24_s26, 128  ;;  %p799_p6 = scmp.lt.s32.totalorder %s24_s26, %s24_s26 }
  0x2b   :  { %p795_p5 = scmp.ne.s32.totalorder %s24_s26, %s794_s25  ;;  %p800_p7 = scmp.lt.s32.totalorder %s794_s25, %s794_s25 }
  0x2d   :  { %p801_p8 = por %p800_p7, %p799_p6 }
  0x2f   :  { %p802_p9 = pnand %p801_p8, %p795_p5 }
  0x31   :  { %805 = shalt.err (!%p802_p9)
}
  0x32   :  { %26 = dma.hbm_to_vmem [thread:$0]  %s1037_s0, 128, %s24_s26, [#allocation3]  }
  0x33   :  { %s861_s27 = smov [#allocation6]   ;;  %s862_s29 = smov [#allocation9]  }
  0x34   :  { %s46_s28 = sshll.u32 %s861_s27, 4  ;;  %s74_s30 = sshll.u32 %s862_s29, 4  ;;  %s47_s28 = int_to_ptr.vmem [resolvable:$true] %s46_s28  ;;  %s75_s30 = int_to_ptr.vmem [resolvable:$true] %s74_s30 }
  0x35   :  { %s806_s13 = scalar_lea.hbm %s1040_s3, 2048 }
  0x36   :  { %p807_p10 = scmp.ne.s32.totalorder %s1040_s3, %s806_s13  ;;  %p810_p11 = scmp.lt.u32.totalorder %s806_s13, %s1040_s3 }
  0x38   :  { %p812_p12 = pnand %p810_p11, %p807_p10 }
  0x3a   :  { %815 = shalt.err (!%p812_p12)
}
  0x3b   :  { %s816_s0 = scalar_lea.vmem %s47_s28, 2048  ;;  %p821_p0 = scmp.lt.s32.totalorder %s47_s28, %s47_s28 }
  0x3c   :  { %p817_p13 = scmp.ne.s32.totalorder %s47_s28, %s816_s0  ;;  %p822_p1 = scmp.lt.s32.totalorder %s816_s0, %s816_s0 }
  0x3e   :  { %p823_p2 = por %p822_p1, %p821_p0 }
  0x40   :  { %p824_p3 = pnand %p823_p2, %p817_p13 }
  0x42   :  { %827 = shalt.err (!%p824_p3)
}
  0x43   :  { %52 = dma.hbm_to_vmem [thread:$0]  %s1040_s3, 2048, %s47_s28, [#allocation5], %s857_s19, %s857_s19, %s858_s20  }
  0x44   :  { %s828_s21 = scalar_lea.hbm %s1044_s7, 2048 }
  0x45   :  { %p829_p4 = scmp.ne.s32.totalorder %s1044_s7, %s828_s21  ;;  %p832_p5 = scmp.lt.u32.totalorder %s828_s21, %s1044_s7 }
  0x47   :  { %p834_p6 = pnand %p832_p5, %p829_p4 }
  0x49   :  { %837 = shalt.err (!%p834_p6)
}
  0x4a   :  { %s838_s24 = scalar_lea.vmem %s75_s30, 2048  ;;  %p843_p8 = scmp.lt.s32.totalorder %s75_s30, %s75_s30 }
  0x4b   :  { %p839_p7 = scmp.ne.s32.totalorder %s75_s30, %s838_s24  ;;  %p844_p9 = scmp.lt.s32.totalorder %s838_s24, %s838_s24 }
  0x4d   :  { %p845_p10 = por %p844_p9, %p843_p8 }
  0x4f   :  { %p846_p11 = pnand %p845_p10, %p839_p7 }
  0x51   :  { %849 = shalt.err (!%p846_p11)
}
  0x52   :  { %80 = dma.hbm_to_vmem [thread:$0]  %s1044_s7, 2048, %s75_s30, [#allocation8], %s857_s19, %s857_s19, %s858_s20  }
  0x53   :  { %850 = dma.done.wait [#allocation3], 128  }
  0x54   :  { %851 = vsyncadd [#allocation3], 4294967168 }
  0x55   :  { %852 = dma.done.wait [#allocation5], 2560  }
  0x56   :  { %853 = vsyncadd [#allocation5], 4294964736 }
  0x57   :  { %854 = dma.done.wait [#allocation8], 4096  }
  0x58   :  { %855 = vsyncadd [#allocation8], 4294963200  ;;  %v863_v0 = vmov 0.0|0.0   ;;  %vm864_vm0 = vmmov 0   ;;  %v865_v1 = vmov 0.0   ;;  %v99_v2 = vld [vmem:[#allocation4] sm:$0xff] }
  0x59   :  { %652 = vmatprep.subr.bf16.mxu0 %v863_v0  ;;  %544 = vmatprep.mubr.msk.f32.mxu0 %vm864_vm0, %v865_v1  ;;  %v100_v3 = vld [vmem:[#allocation4 + $0x8] sm:$0xff]  ;;  %v101_v4 = vld [vmem:[#allocation4 + $0x10] sm:$0xff]  ;;  %v102_v6 = vld [vmem:[#allocation4 + $0x18] sm:$0xff]  ;;  %vm110_vm1 = vcmask 261120   ;;  %vm466_vm2 = vcmask 31744  }
  0x5a   :  { %658 = vmatprep.subr.bf16.mxu1 %v863_v0  ;;  %579 = vmatprep.mubr.msk.f32.mxu1 %vm864_vm0, %v865_v1  ;;  %v653_v5 = vpack.c.bf16 %v100_v3, %v99_v2  ;;  %v185_v7 = vld [vmem:[#allocation6] sm:$0xff]  ;;  %v186_v8 = vld [vmem:[#allocation6 + $0x8] sm:$0xff]  ;;  %v187_v9 = vld [vmem:[#allocation6 + $0x10] sm:$0xff]  ;;  %v656_v11 = vpack.c.bf16 %v102_v6, %v101_v4 }
  0x5b   :  { %v188_v10 = vld [vmem:[#allocation6 + $0x18] sm:$0xff]  ;;  %v659_v12 = vpack.c.bf16 %v186_v8, %v185_v7  ;;  %v189_v14 = vld [vmem:[#allocation6 + $0x20] sm:$0xff]  ;;  %v190_v15 = vld [vmem:[#allocation6 + $0x28] sm:$0xff] }
  0x5c   :  { %654 = vmatpush3.bf16.msra.mxu0 %v653_v5  ;;  %v662_v13 = vpack.c.bf16 %v188_v10, %v187_v9  ;;  %v98_v16 = vld [vmem:[#allocation2] sm:$0xff]  ;;  %v665_v17 = vpack.c.bf16 %v190_v15, %v189_v14  ;;  %v191_v18 = vld [vmem:[#allocation6 + $0x30] sm:$0xff]  ;;  %v193_v21 = vld [vmem:[#allocation6 + $0x40] sm:$0xff] }
  0x5d   :  { %655 = vmatprep.subr.bf16.mxu0 %v863_v0  ;;  %660 = vmatpush3.bf16.msra.mxu1 %v659_v12  ;;  %v192_v19 = vld [vmem:[#allocation6 + $0x38] sm:$0xff]  ;;  %v194_v22 = vld [vmem:[#allocation6 + $0x48] sm:$0xff]  ;;  %v195_v24 = vld [vmem:[#allocation6 + $0x50] sm:$0xff] }
  0x5e   :  { %661 = vmatprep.subr.bf16.mxu1 %v863_v0  ;;  %v668_v20 = vpack.c.bf16 %v192_v19, %v191_v18  ;;  %v671_v23 = vpack.c.bf16 %v194_v22, %v193_v21  ;;  %v196_v25 = vld [vmem:[#allocation6 + $0x58] sm:$0xff]  ;;  %v197_v27 = vld [vmem:[#allocation6 + $0x60] sm:$0xff]  ;;  %v198_v28 = vld [vmem:[#allocation6 + $0x68] sm:$0xff] }
  0x5f   :  { %v674_v26 = vpack.c.bf16 %v196_v25, %v195_v24  ;;  %v677_v29 = vpack.c.bf16 %v198_v28, %v197_v27  ;;  %v199_v30 = vld [vmem:[#allocation6 + $0x70] sm:$0xff]  ;;  %v200_v31 = vld [vmem:[#allocation6 + $0x78] sm:$0xff]  ;;  %v279_v33 = vld [vmem:[#allocation7] sm:$0xff] }
  0x60   :  { %657 = vmatpush3.bf16.msra.mxu0 %v656_v11  ;;  %v680_v32 = vpack.c.bf16 %v200_v31, %v199_v30  ;;  %v280_v34 = vld [vmem:[#allocation7 + $0x8] sm:$0xff]  ;;  %v281_v35 = vld [vmem:[#allocation7 + $0x10] sm:$0xff]  ;;  %v282_v37 = vld [vmem:[#allocation7 + $0x18] sm:$0xff] }
  0x61   :  { %682 = vmatprep.subr.bf16.mxu0 %v863_v0  ;;  %663 = vmatpush3.bf16.msra.mxu1 %v662_v13  ;;  %v683_v36 = vpack.c.bf16 %v280_v34, %v279_v33  ;;  %v686_v38 = vpack.c.bf16 %v282_v37, %v281_v35  ;;  %v283_v39 = vld [vmem:[#allocation7 + $0x20] sm:$0xff]  ;;  %v284_v40 = vld [vmem:[#allocation7 + $0x28] sm:$0xff]  ;;  %v285_v42 = vld [vmem:[#allocation7 + $0x30] sm:$0xff] }
  0x62   :  { %664 = vmatprep.subr.bf16.mxu1 %v863_v0  ;;  %v689_v41 = vpack.c.bf16 %v284_v40, %v283_v39  ;;  %v286_v43 = vld [vmem:[#allocation7 + $0x38] sm:$0xff]  ;;  %v287_v45 = vld [vmem:[#allocation7 + $0x40] sm:$0xff]  ;;  %v288_v46 = vld [vmem:[#allocation7 + $0x48] sm:$0xff] }
  0x63   :  { %545 = vmatmul.mubr.msk.f32.vlgmr.msra.gmra.mrb[0].mxu0 %vm110_vm1, %v98_v16  ;;  %v692_v44 = vpack.c.bf16 %v286_v43, %v285_v42  ;;  %v695_v47 = vpack.c.bf16 %v288_v46, %v287_v45  ;;  %v289_v48 = vld [vmem:[#allocation7 + $0x50] sm:$0xff]  ;;  %v290_v49 = vld [vmem:[#allocation7 + $0x58] sm:$0xff]  ;;  %v291_v51 = vld [vmem:[#allocation7 + $0x60] sm:$0xff] }
  0x64   :  { %614 = vmatprep.mubr.msk.f32.mxu0 %vm864_vm0, %v865_v1  ;;  %684 = vmatpush3.bf16.msra.mxu0 %v683_v36  ;;  %v698_v50 = vpack.c.bf16 %v290_v49, %v289_v48  ;;  %v292_v52 = vld [vmem:[#allocation7 + $0x68] sm:$0xff]  ;;  %v475_v54 = vld [vmem:[%s1039_s2] ss:$0 sm:$0xff]  ;;  %v294_v60 = vld [vmem:[#allocation7 + $0x78] sm:$0xff] }
  0x65   :  { %666 = vmatpush3.bf16.msra.mxu1 %v665_v17  ;;  %685 = vmatprep.subr.bf16.mxu0 %v863_v0  ;;  %v701_v53 = vpack.c.bf16 %v292_v52, %v291_v51  ;;  %v293_v59 = vld [vmem:[#allocation7 + $0x70] sm:$0xff]  ;;  %v373_v62 = vld [vmem:[#allocation9] sm:$0xff]  ;;  %v374_v63 = vld [vmem:[#allocation9 + $0x8] sm:$0xff] }
  0x66   :  { %667 = vmatprep.subr.bf16.mxu1 %v863_v0  ;;  %v704_v61 = vpack.c.bf16 %v294_v60, %v293_v59  ;;  %v375_v2 = vld [vmem:[#allocation9 + $0x10] sm:$0xff]  ;;  %v707_v3 = vpack.c.bf16 %v374_v63, %v373_v62  ;;  %v376_v4 = vld [vmem:[#allocation9 + $0x18] sm:$0xff]  ;;  %v377_v6 = vld [vmem:[#allocation9 + $0x20] sm:$0xff] }
  0x67   :  { %v710_v5 = vpack.c.bf16 %v376_v4, %v375_v2  ;;  %v378_v7 = vld [vmem:[#allocation9 + $0x28] sm:$0xff]  ;;  %v380_v9 = vld [vmem:[#allocation9 + $0x38] sm:$0xff]  ;;  %v381_v11 = vld [vmem:[#allocation9 + $0x40] sm:$0xff] }
  0x68   :  { %687 = vmatpush3.bf16.msra.mxu0 %v686_v38  ;;  %v713_v8 = vpack.c.bf16 %v378_v7, %v377_v6  ;;  %v382_v12 = vld [vmem:[#allocation9 + $0x48] sm:$0xff]  ;;  %v383_v14 = vld [vmem:[#allocation9 + $0x50] sm:$0xff]  ;;  %v384_v15 = vld [vmem:[#allocation9 + $0x58] sm:$0xff] }
  0x69   :  { %669 = vmatpush3.bf16.msra.mxu1 %v668_v20  ;;  %688 = vmatprep.subr.bf16.mxu0 %v863_v0  ;;  %v719_v13 = vpack.c.bf16 %v382_v12, %v381_v11  ;;  %v722_v16 = vpack.c.bf16 %v384_v15, %v383_v14  ;;  %v385_v17 = vld [vmem:[#allocation9 + $0x60] sm:$0xff]  ;;  %v386_v18 = vld [vmem:[#allocation9 + $0x68] sm:$0xff]  ;;  %v477_v20 = vld [vmem:[%s1041_s4] ss:$0 sm:$0xff] }
  0x6a   :  { %670 = vmatprep.subr.bf16.mxu1 %v863_v0  ;;  %v725_v19 = vpack.c.bf16 %v386_v18, %v385_v17  ;;  %v387_v25 = vld [vmem:[#allocation9 + $0x70] sm:$0xff] }
  0x6b   :  { %v478_v28 = vld [vmem:[%s1043_s6] ss:$0 sm:$0xff] }
  0x6c   :  { %690 = vmatpush3.bf16.msra.mxu0 %v689_v41 }
  0x6d   :  { %672 = vmatpush3.bf16.msra.mxu1 %v671_v23  ;;  %691 = vmatprep.subr.bf16.mxu0 %v863_v0 }
  0x6e   :  { %673 = vmatprep.subr.bf16.mxu1 %v863_v0 }
  0x70   :  { %693 = vmatpush3.bf16.msra.mxu0 %v692_v44 }
  0x71   :  { %675 = vmatpush3.bf16.msra.mxu1 %v674_v26  ;;  %694 = vmatprep.subr.bf16.mxu0 %v863_v0  ;;  %v388_v26 = vld [vmem:[#allocation9 + $0x78] sm:$0xff] }
  0x72   :  { %676 = vmatprep.subr.bf16.mxu1 %v863_v0  ;;  %v728_v27 = vpack.c.bf16 %v388_v26, %v387_v25 }
  0x74   :  { %696 = vmatpush3.bf16.msra.mxu0 %v695_v47 }
  0x75   :  { %678 = vmatpush3.bf16.msra.mxu1 %v677_v29  ;;  %697 = vmatprep.subr.bf16.mxu0 %v863_v0 }
  0x76   :  { %679 = vmatprep.subr.bf16.mxu1 %v863_v0 }
  0x78   :  { %699 = vmatpush3.bf16.msra.mxu0 %v698_v50 }
  0x79   :  { %681 = vmatpush3.bf16.msra.mxu1 %v680_v32  ;;  %700 = vmatprep.subr.bf16.mxu0 %v863_v0  ;;  %v479_v32 = vld [vmem:[%s1045_s8] ss:$0 sm:$0xff] }
  0x7a   :  { %706 = vmatprep.subr.bf16.mxu1 %v863_v0 }
  0x7c   :  { %702 = vmatpush3.bf16.msra.mxu0 %v701_v53 }
  0x7d   :  { %703 = vmatprep.subr.bf16.mxu0 %v863_v0 }
  0x80   :  { %705 = vmatpush3.bf16.msra.mxu0 %v704_v61 }
 0x136   :  { %v180_v55 = vpop.f32.mrb[0].mxu0 }
 0x137   :  { %v181_v56 = vadd.f32 %v475_v54, %v180_v55  ;;  %v546_v57 = vpop.f32.mrb[1].mxu0 }
 0x139   :  { %v184_v58 = vmax.f32 %v181_v56, 0.0 }
 0x13b   :  { %580 = vmatmul.mubr.f32.vlgmr.msra.gmra.mrb[0].mxu1 %v184_v58 }
 0x13c   :  { %649 = vmatprep.mubr.msk.f32.mxu1 %vm864_vm0, %v865_v1  ;;  %708 = vmatpush3.bf16.msra.mxu1 %v707_v3  ;;  %v379_v1 = vld [vmem:[#allocation9 + $0x30] sm:$0xff] }
 0x13d   :  { %709 = vmatprep.subr.bf16.mxu1 %v863_v0  ;;  %v716_v10 = vpack.c.bf16 %v380_v9, %v379_v1 }
 0x140   :  { %711 = vmatpush3.bf16.msra.mxu1 %v710_v5 }
 0x141   :  { %712 = vmatprep.subr.bf16.mxu1 %v863_v0 }
 0x144   :  { %714 = vmatpush3.bf16.msra.mxu1 %v713_v8 }
 0x145   :  { %715 = vmatprep.subr.bf16.mxu1 %v863_v0 }
 0x148   :  { %717 = vmatpush3.bf16.msra.mxu1 %v716_v10 }
 0x149   :  { %718 = vmatprep.subr.bf16.mxu1 %v863_v0 }
 0x14c   :  { %720 = vmatpush3.bf16.msra.mxu1 %v719_v13 }
 0x14d   :  { %721 = vmatprep.subr.bf16.mxu1 %v863_v0 }
 0x150   :  { %723 = vmatpush3.bf16.msra.mxu1 %v722_v16 }
 0x151   :  { %724 = vmatprep.subr.bf16.mxu1 %v863_v0 }
 0x154   :  { %726 = vmatpush3.bf16.msra.mxu1 %v725_v19 }
 0x155   :  { %727 = vmatprep.subr.bf16.mxu1 %v863_v0 }
 0x158   :  { %729 = vmatpush3.bf16.msra.mxu1 %v728_v27 }
 0x20e   :  { %v274_v21 = vpop.f32.mrb[0].mxu1 }
 0x20f   :  { %v275_v22 = vadd.f32 %v477_v20, %v274_v21  ;;  %v581_v23 = vpop.f32.mrb[1].mxu1 }
 0x211   :  { %v278_v24 = vmax.f32 %v275_v22, 0.0 }
 0x213   :  { %615 = vmatmul.mubr.f32.vlgmr.msra.gmra.mrb[2].mxu0 %v278_v24 }
 0x2e6   :  { %v368_v29 = vpop.f32.mrb[2].mxu0 }
 0x2e7   :  { %v369_v30 = vadd.f32 %v478_v28, %v368_v29  ;;  %v616_v0 = vpop.f32.mrb[3].mxu0 }
 0x2e9   :  { %v372_v31 = vmax.f32 %v369_v30, 0.0 }
 0x2eb   :  { %650 = vmatmul.mubr.f32.vlgmr.msra.gmra.mrb[2].mxu1 %v372_v31 }
 0x3be   :  { %v462_v33 = vpop.f32.mrb[2].mxu1 }
 0x3bf   :  { %v463_v34 = vadd.f32 %v479_v32, %v462_v33  ;;  %v651_v35 = vpop.f32.mrb[3].mxu1 }
 0x3c1   :  { %467 = vst.msk [vmem:[%s1046_s9] sm:$0xff] %vm466_vm2, %v463_v34 }
 0x3c2   :  { %472 = vsyncpa [#allocation3], 1 }
 0x3c3   :  { %473 = vsyncpa [#allocation5], 1 }
 0x3c4   :  { %474 = vsyncpa [#allocation8], 1 }

</bundles_post_ra>
